<compile_context>
chip_gen: v5e
topology: v5e:2x2
jax: 0.10.0
libtpu: 0.0.40
codegen_flags: <defaults>
</compile_context>

<pallas_src>
import jax
import jax.numpy as jnp
from jax.experimental import pallas as pl
from jax.experimental.pallas import tpu as pltpu

EPS = 1e-7
INV_TEMP = 10.0          # 1 / temperature (temperature = 0.1)


def _round_up(a, m):
    return (a + m - 1) // m * m


# ----------------------------- kernel ---------------------------------------

def _cdrop(x, u, A, invr):
    """x * retain / (1 - p)  with  retain = 1 / (1 + A * r^10),  r = (u+e)/(1-u+e).

    A = ((p+eps)/(1-p+eps))^10 is precomputed on the host, so no log/exp is
    needed per element; r^10 is computed by repeated squaring (VPU muls).
    Overflow of r^10 to inf (u -> 1) saturates retain to 0, the correct limit.
    """
    r = (u + EPS) / (1.0 - u + EPS)
    r2 = r * r
    r4 = r2 * r2
    r8 = r4 * r4
    r10 = r8 * r2
    retain = 1.0 / (1.0 + A * r10)
    return x * (retain * invr)


def _kernel(a01_ref, invr01_ref,                    # SMEM scalars, sites 0/1
            x_ref, n1_ref, n2_ref, n34_ref,         # streamed (TB, feat) tiles
            w1_ref, b1_ref, w2_ref, b2_ref,         # pinned weights
            wh_ref, bh_ref, a34_ref, invr34_ref,    # fused head weight + consts
            out_ref):
    mmdt = w1_ref.dtype                             # f32 or bf16 matmul inputs
    x = x_ref[...]

    # layer 1: dropout -> linear -> relu
    h = _cdrop(x, n1_ref[...], a01_ref[0], invr01_ref[0])
    h1 = jnp.maximum(
        jnp.dot(h.astype(mmdt), w1_ref[...],
                preferred_element_type=jnp.float32) + b1_ref[...], 0.0)

    # layer 2: dropout -> linear -> relu
    h = _cdrop(h1, n2_ref[...], a01_ref[1], invr01_ref[1])
    h2 = jnp.maximum(
        jnp.dot(h.astype(mmdt), w2_ref[...],
                preferred_element_type=jnp.float32) + b2_ref[...], 0.0)

    # fused mu/logvar heads: duplicate h2 along lanes, one dropout pass with
    # lane-varying constants, one dot against the block-stacked head weight.
    h2cat = jnp.concatenate([h2, h2], axis=1)                   # (TB, 2*H2)
    hd = _cdrop(h2cat, n34_ref[...], a34_ref[...], invr34_ref[...])
    out = (jnp.dot(hd.astype(mmdt), wh_ref[...],
                   preferred_element_type=jnp.float32) + bh_ref[...])
    out_ref[...] = out.astype(out_ref.dtype)


# ----------------------------- wrapper ---------------------------------------

def make_params(key, in_f, h1, h2, out_f):
    ks = jax.random.split(key, 8)

    def lin(kw, kb, fin, fout):
        lim = 1.0 / jnp.sqrt(jnp.float32(fin))
        w = jax.random.uniform(kw, (fin, fout), jnp.float32, -lim, lim)
        b = jax.random.uniform(kb, (1, fout), jnp.float32, -lim, lim)
        return w, b

    w1, b1 = lin(ks[0], ks[1], in_f, h1)
    w2, b2 = lin(ks[2], ks[3], h1, h2)
    wmu, bmu = lin(ks[4], ks[5], h2, out_f)
    wlv, blv = lin(ks[6], ks[7], h2, out_f)
    # torch init: uniform(logit(0.1), logit(0.1)) -> deterministic logit(0.1)
    p_logit = jnp.full((4,), jnp.log(0.1) - jnp.log(0.9), jnp.float32)
    return dict(w1=w1, b1=b1, w2=w2, b2=b2,
                wmu=wmu, bmu=bmu, wlv=wlv, blv=blv, p_logit=p_logit)


def model_forward(params, x, noise=None, *, seed=0,
                  weight_regularizer=1e-6, dropout_regularizer=1e-5,
                  block_batch=1024, matmul_dtype=jnp.float32):
    """noise = (n1, n2, n3, n4) uniforms, or None -> host-side jax.random."""
    B, Din = x.shape
    H1 = params["w1"].shape[1]
    H2 = params["w2"].shape[1]
    Dout = params["wmu"].shape[1]
    Nout = 2 * Dout

    if noise is None:
        key = jax.random.PRNGKey(seed)
        k1, k2, k3, k4 = jax.random.split(key, 4)
        noise = (jax.random.uniform(k1, (B, Din), jnp.float32),
                 jax.random.uniform(k2, (B, H1), jnp.float32),
                 jax.random.uniform(k3, (B, H2), jnp.float32),
                 jax.random.uniform(k4, (B, H2), jnp.float32))
    n1, n2, n3, n4 = noise

    # per-layer scalars (host precompute)
    p = jax.nn.sigmoid(params["p_logit"])                       # (4,)
    A = ((p + EPS) / (1.0 - p + EPS)) ** INV_TEMP               # exp(logit(p)/temp)
    invr = 1.0 / (1.0 - p)

    # regularizer: batch-independent -> hoisted out of the kernel
    def ssq(w, b):
        return jnp.sum(w.astype(jnp.float32) ** 2) + jnp.sum(b.astype(jnp.float32) ** 2)
    ssqs = jnp.stack([ssq(params["w1"], params["b1"]),
                      ssq(params["w2"], params["b2"]),
                      ssq(params["wmu"], params["bmu"]),
                      ssq(params["wlv"], params["blv"])])
    dims = jnp.array([Din, H1, H2, H2], jnp.float32)
    reg = jnp.sum(weight_regularizer * ssqs / (1.0 - p)
                  + (p * jnp.log(p) + (1.0 - p) * jnp.log(1.0 - p))
                  * dropout_regularizer * dims)

    # batch tiling: cap TB so there are >= 4 grid tiles (feeds both v7x TCs)
    TB = _round_up(max(8, min(block_batch, -(-B // 4))), 8)
    B_pad = _round_up(B, TB)
    grid = (B_pad // TB,)

    def pad_rows(a, value):
        if B_pad == B:
            return a
        return jnp.pad(a, ((0, B_pad - B), (0, 0)), constant_values=value)

    x_p = pad_rows(x.astype(jnp.float32), 0.0)
    n1_p = pad_rows(n1.astype(jnp.float32), 0.5)
    n2_p = pad_rows(n2.astype(jnp.float32), 0.5)
    n34_p = pad_rows(jnp.concatenate([n3, n4], axis=1).astype(jnp.float32), 0.5)

    # weights: cast to matmul dtype; mu/logvar heads stacked block-diagonally
    mm = matmul_dtype
    w1 = params["w1"].astype(mm)
    w2 = params["w2"].astype(mm)
    b1 = params["b1"].astype(jnp.float32)
    b2 = params["b2"].astype(jnp.float32)
    wh = (jnp.zeros((2 * H2, Nout), mm)
          .at[:H2, :Dout].set(params["wmu"].astype(mm))
          .at[H2:, Dout:].set(params["wlv"].astype(mm)))
    bh = jnp.concatenate([params["bmu"], params["blv"]], axis=1).astype(jnp.float32)

    # lane-varying dropout constants for the fused head (sites 2 and 3)
    a34 = jnp.concatenate([jnp.full((1, H2), A[2], jnp.float32),
                           jnp.full((1, H2), A[3], jnp.float32)], axis=1)
    invr34 = jnp.concatenate([jnp.full((1, H2), invr[2], jnp.float32),
                              jnp.full((1, H2), invr[3], jnp.float32)], axis=1)

    smem = pl.BlockSpec(memory_space=pltpu.MemorySpace.SMEM)

    def row(feat):
        return pl.BlockSpec((TB, feat), lambda i: (i, 0))

    def pin(shape):
        return pl.BlockSpec(shape, lambda i: (0,) * len(shape))

    in_specs = [smem, smem,
                row(Din), row(Din), row(H1), row(2 * H2),
                pin((Din, H1)), pin((1, H1)),
                pin((H1, H2)), pin((1, H2)),
                pin((2 * H2, Nout)), pin((1, Nout)),
                pin((1, 2 * H2)), pin((1, 2 * H2))]
    inputs = [A[:2], invr[:2],
              x_p, n1_p, n2_p, n34_p,
              w1, b1, w2, b2, wh, bh, a34, invr34]

    # explicit VMEM budget (headroom for v7x's 64 MiB per-TC VMEM)
    mm_bytes = jnp.dtype(mm).itemsize
    stream_cols = 2 * Din + H1 + 2 * H2 + Nout
    stream_bytes = 2 * TB * stream_cols * 4                     # double-buffered tiles
    weight_bytes = 2 * ((Din * H1 + H1 * H2 + 2 * H2 * Nout) * mm_bytes
                        + (H1 + H2 + Nout + 4 * H2) * 4)
    vmem_limit = int(min(48 * 2**20,
                         max(16 * 2**20, 3 * (stream_bytes + weight_bytes))))

    out = pl.pallas_call(
        _kernel,
        grid=grid,
        out_shape=jax.ShapeDtypeStruct((B_pad, Nout), jnp.float32),
        in_specs=in_specs,
        out_specs=row(Nout),
        compiler_params=pltpu.CompilerParams(
            dimension_semantics=("parallel",),   # v7x: batch tiles across 2 TCs
            vmem_limit_bytes=vmem_limit),
    )(*inputs)

    mean = out[:B, :Dout]
    log_var = out[:B, Dout:Nout]
    return mean, log_var, reg


# ----------------------------- pure-JAX reference ----------------------------

def reference_forward(params, x, n1, n2, n3, n4,
                      weight_regularizer=1e-6, dropout_regularizer=1e-5):
    """Pure-JAX mirror of the PyTorch module semantics."""
    p = jax.nn.sigmoid(params["p_logit"])
    TEMP = 0.1

    def cdrop(x, u, pk):
        dp = (jnp.log(pk + EPS) - jnp.log(1.0 - pk + EPS)
              + jnp.log(u + EPS) - jnp.log(1.0 - u + EPS))
        dp = jax.nn.sigmoid(dp / TEMP)
        return x * (1.0 - dp) / (1.0 - pk)

    def ssq(w, b):
        return jnp.sum(w ** 2) + jnp.sum(b ** 2)

    def reg_term(pk, s, dim):
        wr = weight_regularizer * s / (1.0 - pk)
        dr = (pk * jnp.log(pk) + (1.0 - pk) * jnp.log(1.0 - pk)) \
            * dropout_regularizer * dim
        return wr + dr

    h1 = jax.nn.relu(cdrop(x, n1, p[0]) @ params["w1"] + params["b1"])
    h2 = jax.nn.relu(cdrop(h1, n2, p[1]) @ params["w2"] + params["b2"])
    mean = cdrop(h2, n3, p[2]) @ params["wmu"] + params["bmu"]
    log_var = cdrop(h2, n4, p[3]) @ params["wlv"] + params["blv"]
    reg = (reg_term(p[0], ssq(params["w1"], params["b1"]), x.shape[1])
           + reg_term(p[1], ssq(params["w2"], params["b2"]), h1.shape[1])
           + reg_term(p[2], ssq(params["wmu"], params["bmu"]), h2.shape[1])
           + reg_term(p[3], ssq(params["wlv"], params["blv"]), h2.shape[1]))
    return mean, log_var, reg


# ----------------------------- test ------------------------------------------

if __name__ == "__main__":
    B, Din, H1, H2, Dout = 100, 16, 32, 32, 4
    key = jax.random.PRNGKey(0)
    kp, kx, k1, k2, k3, k4 = jax.random.split(key, 6)

    params = make_params(kp, Din, H1, H2, Dout)
    x = jax.random.normal(kx, (B, Din), jnp.float32)
    noise = (jax.random.uniform(k1, (B, Din), jnp.float32),
             jax.random.uniform(k2, (B, H1), jnp.float32),
             jax.random.uniform(k3, (B, H2), jnp.float32),
             jax.random.uniform(k4, (B, H2), jnp.float32))

    rm, rl, rr = reference_forward(params, x, *noise)

    # 1) f32 matmul path with explicit noise: comparable to the reference.
    #    B=100 -> TB=32, B padded to 128, 4 grid steps (exercises tiling).
    mean, log_var, reg = model_forward(params, x, noise=noise)
    jax.block_until_ready((mean, log_var, reg))
    assert mean.shape == (B, Dout) and log_var.shape == (B, Dout)
    assert jnp.allclose(mean, rm, rtol=2e-3, atol=2e-3)
    assert jnp.allclose(log_var, rl, rtol=2e-3, atol=2e-3)
    assert jnp.allclose(reg, rr, rtol=1e-5, atol=1e-7)

    # 2) bf16 matmul inputs (MXU-native); f32 accumulation and elementwise math.
    mean_bf, log_var_bf, _ = model_forward(params, x, noise=noise,
                                           matmul_dtype=jnp.bfloat16)
    jax.block_until_ready((mean_bf, log_var_bf))
    assert jnp.allclose(mean_bf, rm, rtol=5e-2, atol=5e-2)
    assert jnp.allclose(log_var_bf, rl, rtol=5e-2, atol=5e-2)

    # 3) no-noise path (host-side jax.random, same as torch.rand_like semantics)
    mean_r, log_var_r, reg_r = model_forward(params, x, noise=None, seed=1234)
    jax.block_until_ready((mean_r, log_var_r, reg_r))
    assert mean_r.shape == (B, Dout) and log_var_r.shape == (B, Dout)
    assert bool(jnp.all(jnp.isfinite(mean_r)))
    assert bool(jnp.all(jnp.isfinite(log_var_r)))
    assert jnp.allclose(reg_r, rr, rtol=1e-5, atol=1e-7)

    print("KERNEL_OK")
</pallas_src>

<mosaic_0001>
module attributes {stable_mosaic.version = 11 : i64} {
  func.func @_kernel(%arg0: i32, %arg1: memref<2xf32, #tpu.memory_space<smem>>, %arg2: memref<2xf32, #tpu.memory_space<smem>>, %arg3: memref<32x16xf32, #tpu.memory_space<vmem>>, %arg4: memref<32x16xf32, #tpu.memory_space<vmem>>, %arg5: memref<32x32xf32, #tpu.memory_space<vmem>>, %arg6: memref<32x64xf32, #tpu.memory_space<vmem>>, %arg7: memref<16x32xf32, #tpu.memory_space<vmem>>, %arg8: memref<1x32xf32, #tpu.memory_space<vmem>>, %arg9: memref<32x32xf32, #tpu.memory_space<vmem>>, %arg10: memref<1x32xf32, #tpu.memory_space<vmem>>, %arg11: memref<64x8xf32, #tpu.memory_space<vmem>>, %arg12: memref<1x8xf32, #tpu.memory_space<vmem>>, %arg13: memref<1x64xf32, #tpu.memory_space<vmem>>, %arg14: memref<1x64xf32, #tpu.memory_space<vmem>>, %arg15: memref<32x8xf32, #tpu.memory_space<vmem>>) attributes {dimension_semantics = [#tpu.dimension_semantics<parallel>], iteration_bounds = array<i64: 4>, scalar_prefetch = 0 : i64, scratch_operands = 0 : i64, tpu.core_type = #tpu.core_type<tc>, window_params = [{transform_indices = @transform_0, window_bounds = array<i64: 2>}, {transform_indices = @transform_1, window_bounds = array<i64: 2>}, {transform_indices = @transform_2, window_bounds = array<i64: 32, 16>}, {transform_indices = @transform_3, window_bounds = array<i64: 32, 16>}, {transform_indices = @transform_4, window_bounds = array<i64: 32, 32>}, {transform_indices = @transform_5, window_bounds = array<i64: 32, 64>}, {pipeline_mode = #tpu.pipeline_mode<synchronous>, transform_indices = @transform_6, window_bounds = array<i64: 16, 32>}, {pipeline_mode = #tpu.pipeline_mode<synchronous>, transform_indices = @transform_7, window_bounds = array<i64: 1, 32>}, {pipeline_mode = #tpu.pipeline_mode<synchronous>, transform_indices = @transform_8, window_bounds = array<i64: 32, 32>}, {pipeline_mode = #tpu.pipeline_mode<synchronous>, transform_indices = @transform_9, window_bounds = array<i64: 1, 32>}, {pipeline_mode = #tpu.pipeline_mode<synchronous>, transform_indices = @transform_10, window_bounds = array<i64: 64, 8>}, {pipeline_mode = #tpu.pipeline_mode<synchronous>, transform_indices = @transform_11, window_bounds = array<i64: 1, 8>}, {pipeline_mode = #tpu.pipeline_mode<synchronous>, transform_indices = @transform_12, window_bounds = array<i64: 1, 64>}, {pipeline_mode = #tpu.pipeline_mode<synchronous>, transform_indices = @transform_13, window_bounds = array<i64: 1, 64>}, {transform_indices = @transform_14, window_bounds = array<i64: 32, 8>}]} {
    %c0 = arith.constant 0 : index
    %c0_0 = arith.constant 0 : index
    %0 = vector.load %arg3[%c0, %c0_0] : memref<32x16xf32, #tpu.memory_space<vmem>>, vector<32x16xf32>
    %c0_1 = arith.constant 0 : index
    %c0_2 = arith.constant 0 : index
    %1 = vector.load %arg4[%c0_1, %c0_2] : memref<32x16xf32, #tpu.memory_space<vmem>>, vector<32x16xf32>
    %c0_3 = arith.constant 0 : index
    %2 = memref.load %arg1[%c0_3] : memref<2xf32, #tpu.memory_space<smem>>
    %c0_4 = arith.constant 0 : index
    %3 = memref.load %arg2[%c0_4] : memref<2xf32, #tpu.memory_space<smem>>
    %cst = arith.constant 1.000000e-07 : f32
    %4 = vector.broadcast %cst : f32 to vector<32x16xf32>
    %5 = arith.addf %1, %4 : vector<32x16xf32>
    %cst_5 = arith.constant 1.000000e+00 : f32
    %6 = vector.broadcast %cst_5 : f32 to vector<32x16xf32>
    %7 = arith.subf %6, %1 : vector<32x16xf32>
    %cst_6 = arith.constant 1.000000e-07 : f32
    %8 = vector.broadcast %cst_6 : f32 to vector<32x16xf32>
    %9 = arith.addf %7, %8 : vector<32x16xf32>
    %10 = arith.divf %5, %9 : vector<32x16xf32>
    %11 = arith.mulf %10, %10 : vector<32x16xf32>
    %12 = arith.mulf %11, %11 : vector<32x16xf32>
    %13 = arith.mulf %12, %12 : vector<32x16xf32>
    %14 = arith.mulf %13, %11 : vector<32x16xf32>
    %15 = vector.broadcast %2 : f32 to vector<32x16xf32>
    %16 = arith.mulf %15, %14 : vector<32x16xf32>
    %cst_7 = arith.constant 1.000000e+00 : f32
    %17 = vector.broadcast %cst_7 : f32 to vector<32x16xf32>
    %18 = arith.addf %17, %16 : vector<32x16xf32>
    %cst_8 = arith.constant 1.000000e+00 : f32
    %19 = vector.broadcast %cst_8 : f32 to vector<32x16xf32>
    %20 = arith.divf %19, %18 : vector<32x16xf32>
    %21 = vector.broadcast %3 : f32 to vector<32x16xf32>
    %22 = arith.mulf %20, %21 : vector<32x16xf32>
    %23 = arith.mulf %0, %22 : vector<32x16xf32>
    %c0_9 = arith.constant 0 : index
    %c0_10 = arith.constant 0 : index
    %24 = vector.load %arg7[%c0_9, %c0_10] : memref<16x32xf32, #tpu.memory_space<vmem>>, vector<16x32xf32>
    %cst_11 = arith.constant dense<0.000000e+00> : vector<32x32xf32>
    %25 = tpu.matmul %23, %24, %cst_11 {dimension_numbers = #tpu.dot_dimension_numbers<[1], [0], [0], [1], [0, 0, 1, 1], [], []>} : vector<32x16xf32>, vector<16x32xf32>, vector<32x32xf32> -> vector<32x32xf32>
    %c0_12 = arith.constant 0 : index
    %c0_13 = arith.constant 0 : index
    %26 = vector.load %arg8[%c0_12, %c0_13] : memref<1x32xf32, #tpu.memory_space<vmem>>, vector<1x32xf32>
    %27 = vector.broadcast %26 : vector<1x32xf32> to vector<32x32xf32>
    %28 = arith.addf %25, %27 : vector<32x32xf32>
    %cst_14 = arith.constant 0.000000e+00 : f32
    %29 = vector.broadcast %cst_14 : f32 to vector<32x32xf32>
    %30 = arith.maximumf %28, %29 : vector<32x32xf32>
    %c0_15 = arith.constant 0 : index
    %c0_16 = arith.constant 0 : index
    %31 = vector.load %arg5[%c0_15, %c0_16] : memref<32x32xf32, #tpu.memory_space<vmem>>, vector<32x32xf32>
    %c1 = arith.constant 1 : index
    %32 = memref.load %arg1[%c1] : memref<2xf32, #tpu.memory_space<smem>>
    %c1_17 = arith.constant 1 : index
    %33 = memref.load %arg2[%c1_17] : memref<2xf32, #tpu.memory_space<smem>>
    %cst_18 = arith.constant 1.000000e-07 : f32
    %34 = vector.broadcast %cst_18 : f32 to vector<32x32xf32>
    %35 = arith.addf %31, %34 : vector<32x32xf32>
    %cst_19 = arith.constant 1.000000e+00 : f32
    %36 = vector.broadcast %cst_19 : f32 to vector<32x32xf32>
    %37 = arith.subf %36, %31 : vector<32x32xf32>
    %cst_20 = arith.constant 1.000000e-07 : f32
    %38 = vector.broadcast %cst_20 : f32 to vector<32x32xf32>
    %39 = arith.addf %37, %38 : vector<32x32xf32>
    %40 = arith.divf %35, %39 : vector<32x32xf32>
    %41 = arith.mulf %40, %40 : vector<32x32xf32>
    %42 = arith.mulf %41, %41 : vector<32x32xf32>
    %43 = arith.mulf %42, %42 : vector<32x32xf32>
    %44 = arith.mulf %43, %41 : vector<32x32xf32>
    %45 = vector.broadcast %32 : f32 to vector<32x32xf32>
    %46 = arith.mulf %45, %44 : vector<32x32xf32>
    %cst_21 = arith.constant 1.000000e+00 : f32
    %47 = vector.broadcast %cst_21 : f32 to vector<32x32xf32>
    %48 = arith.addf %47, %46 : vector<32x32xf32>
    %cst_22 = arith.constant 1.000000e+00 : f32
    %49 = vector.broadcast %cst_22 : f32 to vector<32x32xf32>
    %50 = arith.divf %49, %48 : vector<32x32xf32>
    %51 = vector.broadcast %33 : f32 to vector<32x32xf32>
    %52 = arith.mulf %50, %51 : vector<32x32xf32>
    %53 = arith.mulf %30, %52 : vector<32x32xf32>
    %c0_23 = arith.constant 0 : index
    %c0_24 = arith.constant 0 : index
    %54 = vector.load %arg9[%c0_23, %c0_24] : memref<32x32xf32, #tpu.memory_space<vmem>>, vector<32x32xf32>
    %cst_25 = arith.constant dense<0.000000e+00> : vector<32x32xf32>
    %55 = tpu.matmul %53, %54, %cst_25 {dimension_numbers = #tpu.dot_dimension_numbers<[1], [0], [0], [1], [0, 0, 1, 1], [], []>} : vector<32x32xf32>, vector<32x32xf32>, vector<32x32xf32> -> vector<32x32xf32>
    %c0_26 = arith.constant 0 : index
    %c0_27 = arith.constant 0 : index
    %56 = vector.load %arg10[%c0_26, %c0_27] : memref<1x32xf32, #tpu.memory_space<vmem>>, vector<1x32xf32>
    %57 = vector.broadcast %56 : vector<1x32xf32> to vector<32x32xf32>
    %58 = arith.addf %55, %57 : vector<32x32xf32>
    %cst_28 = arith.constant 0.000000e+00 : f32
    %59 = vector.broadcast %cst_28 : f32 to vector<32x32xf32>
    %60 = arith.maximumf %58, %59 : vector<32x32xf32>
    %61 = tpu.concatenate %60, %60 in 1 : vector<32x32xf32>, vector<32x32xf32> -> vector<32x64xf32>
    %c0_29 = arith.constant 0 : index
    %c0_30 = arith.constant 0 : index
    %62 = vector.load %arg6[%c0_29, %c0_30] : memref<32x64xf32, #tpu.memory_space<vmem>>, vector<32x64xf32>
    %c0_31 = arith.constant 0 : index
    %c0_32 = arith.constant 0 : index
    %63 = vector.load %arg13[%c0_31, %c0_32] : memref<1x64xf32, #tpu.memory_space<vmem>>, vector<1x64xf32>
    %c0_33 = arith.constant 0 : index
    %c0_34 = arith.constant 0 : index
    %64 = vector.load %arg14[%c0_33, %c0_34] : memref<1x64xf32, #tpu.memory_space<vmem>>, vector<1x64xf32>
    %cst_35 = arith.constant 1.000000e-07 : f32
    %65 = vector.broadcast %cst_35 : f32 to vector<32x64xf32>
    %66 = arith.addf %62, %65 : vector<32x64xf32>
    %cst_36 = arith.constant 1.000000e+00 : f32
    %67 = vector.broadcast %cst_36 : f32 to vector<32x64xf32>
    %68 = arith.subf %67, %62 : vector<32x64xf32>
    %cst_37 = arith.constant 1.000000e-07 : f32
    %69 = vector.broadcast %cst_37 : f32 to vector<32x64xf32>
    %70 = arith.addf %68, %69 : vector<32x64xf32>
    %71 = arith.divf %66, %70 : vector<32x64xf32>
    %72 = arith.mulf %71, %71 : vector<32x64xf32>
    %73 = arith.mulf %72, %72 : vector<32x64xf32>
    %74 = arith.mulf %73, %73 : vector<32x64xf32>
    %75 = arith.mulf %74, %72 : vector<32x64xf32>
    %76 = vector.broadcast %63 : vector<1x64xf32> to vector<32x64xf32>
    %77 = arith.mulf %76, %75 : vector<32x64xf32>
    %cst_38 = arith.constant 1.000000e+00 : f32
    %78 = vector.broadcast %cst_38 : f32 to vector<32x64xf32>
    %79 = arith.addf %78, %77 : vector<32x64xf32>
    %cst_39 = arith.constant 1.000000e+00 : f32
    %80 = vector.broadcast %cst_39 : f32 to vector<32x64xf32>
    %81 = arith.divf %80, %79 : vector<32x64xf32>
    %82 = vector.broadcast %64 : vector<1x64xf32> to vector<32x64xf32>
    %83 = arith.mulf %81, %82 : vector<32x64xf32>
    %84 = arith.mulf %61, %83 : vector<32x64xf32>
    %c0_40 = arith.constant 0 : index
    %c0_41 = arith.constant 0 : index
    %85 = vector.load %arg11[%c0_40, %c0_41] : memref<64x8xf32, #tpu.memory_space<vmem>>, vector<64x8xf32>
    %cst_42 = arith.constant dense<0.000000e+00> : vector<32x8xf32>
    %86 = tpu.matmul %84, %85, %cst_42 {dimension_numbers = #tpu.dot_dimension_numbers<[1], [0], [0], [1], [0, 0, 1, 1], [], []>} : vector<32x64xf32>, vector<64x8xf32>, vector<32x8xf32> -> vector<32x8xf32>
    %c0_43 = arith.constant 0 : index
    %c0_44 = arith.constant 0 : index
    %87 = vector.load %arg12[%c0_43, %c0_44] : memref<1x8xf32, #tpu.memory_space<vmem>>, vector<1x8xf32>
    %88 = vector.broadcast %87 : vector<1x8xf32> to vector<32x8xf32>
    %89 = arith.addf %86, %88 : vector<32x8xf32>
    %c0_45 = arith.constant 0 : index
    %c0_46 = arith.constant 0 : index
    %90 = vector.load %arg15[%c0_45, %c0_46] : memref<32x8xf32, #tpu.memory_space<vmem>>, vector<32x8xf32>
    tpu.vector_store %arg15[%c0_45, %c0_46], %89 {strides = array<i32>} : memref<32x8xf32, #tpu.memory_space<vmem>>, vector<32x8xf32>,
    return
  }
  func.func @transform_0(%arg0: i32) -> i32 {
    %c0_i32 = arith.constant 0 : i32
    %c0_i32_0 = arith.constant 0 : i32
    return %c0_i32 : i32
  }
  func.func @transform_1(%arg0: i32) -> i32 {
    %c0_i32 = arith.constant 0 : i32
    %c0_i32_0 = arith.constant 0 : i32
    return %c0_i32 : i32
  }
  func.func @transform_2(%arg0: i32) -> (i32, i32) {
    %c0_i32 = arith.constant 0 : i32
    %c0_i32_0 = arith.constant 0 : i32
    return %arg0, %c0_i32 : i32, i32
  }
  func.func @transform_3(%arg0: i32) -> (i32, i32) {
    %c0_i32 = arith.constant 0 : i32
    %c0_i32_0 = arith.constant 0 : i32
    return %arg0, %c0_i32 : i32, i32
  }
  func.func @transform_4(%arg0: i32) -> (i32, i32) {
    %c0_i32 = arith.constant 0 : i32
    %c0_i32_0 = arith.constant 0 : i32
    return %arg0, %c0_i32 : i32, i32
  }
  func.func @transform_5(%arg0: i32) -> (i32, i32) {
    %c0_i32 = arith.constant 0 : i32
    %c0_i32_0 = arith.constant 0 : i32
    return %arg0, %c0_i32 : i32, i32
  }
  func.func @transform_6(%arg0: i32) -> (i32, i32) {
    %c0_i32 = arith.constant 0 : i32
    %c0_i32_0 = arith.constant 0 : i32
    %c0_i32_1 = arith.constant 0 : i32
    return %c0_i32, %c0_i32_0 : i32, i32
  }
  func.func @transform_7(%arg0: i32) -> (i32, i32) {
    %c0_i32 = arith.constant 0 : i32
    %c0_i32_0 = arith.constant 0 : i32
    %c0_i32_1 = arith.constant 0 : i32
    return %c0_i32, %c0_i32_0 : i32, i32
  }
  func.func @transform_8(%arg0: i32) -> (i32, i32) {
    %c0_i32 = arith.constant 0 : i32
    %c0_i32_0 = arith.constant 0 : i32
    %c0_i32_1 = arith.constant 0 : i32
    return %c0_i32, %c0_i32_0 : i32, i32
  }
  func.func @transform_9(%arg0: i32) -> (i32, i32) {
    %c0_i32 = arith.constant 0 : i32
    %c0_i32_0 = arith.constant 0 : i32
    %c0_i32_1 = arith.constant 0 : i32
    return %c0_i32, %c0_i32_0 : i32, i32
  }
  func.func @transform_10(%arg0: i32) -> (i32, i32) {
    %c0_i32 = arith.constant 0 : i32
    %c0_i32_0 = arith.constant 0 : i32
    %c0_i32_1 = arith.constant 0 : i32
    return %c0_i32, %c0_i32_0 : i32, i32
  }
  func.func @transform_11(%arg0: i32) -> (i32, i32) {
    %c0_i32 = arith.constant 0 : i32
    %c0_i32_0 = arith.constant 0 : i32
    %c0_i32_1 = arith.constant 0 : i32
    return %c0_i32, %c0_i32_0 : i32, i32
  }
  func.func @transform_12(%arg0: i32) -> (i32, i32) {
    %c0_i32 = arith.constant 0 : i32
    %c0_i32_0 = arith.constant 0 : i32
    %c0_i32_1 = arith.constant 0 : i32
    return %c0_i32, %c0_i32_0 : i32, i32
  }
  func.func @transform_13(%arg0: i32) -> (i32, i32) {
    %c0_i32 = arith.constant 0 : i32
    %c0_i32_0 = arith.constant 0 : i32
    %c0_i32_1 = arith.constant 0 : i32
    return %c0_i32, %c0_i32_0 : i32, i32
  }
  func.func @transform_14(%arg0: i32) -> (i32, i32) {
    %c0_i32 = arith.constant 0 : i32
    %c0_i32_0 = arith.constant 0 : i32
    return %arg0, %c0_i32 : i32, i32
  }
}

</mosaic_0001>

<bundles_post_ra>
// kernel: tpu_custom_call.1
= control target key start
LH: loop header
LB: loop body
LE: loop exit
PB: predicated region body
PF: predicated region fallthrough
CT: control target
= control target key end

     0   :  { %19 = vsyncpa [#allocation3], 0  ;;  %s1876_s0 = inlined_call_operand.vmem [shape: f32[2], index: 0, kind: input, shape index: {}]   ;;  %s1877_s1 = inlined_call_operand.vmem [shape: f32[2], index: 1, kind: input, shape index: {}]   ;;  %s1878_s2 = inlined_call_operand.vmem [shape: f32[128,16], index: 2, kind: input, shape index: {}]   ;;  %s1879_s3 = inlined_call_operand.vmem [shape: f32[128,16], index: 3, kind: input, shape index: {}]   ;;  %s1880_s4 = inlined_call_operand.vmem [shape: f32[128,32], index: 4, kind: input, shape index: {}]   ;;  %s1881_s5 = inlined_call_operand.vmem [shape: f32[128,64], index: 5, kind: input, shape index: {}]   ;;  %s1882_s6 = inlined_call_operand.vmem [shape: f32[16,32], index: 6, kind: input, shape index: {}]   ;;  %s1883_s7 = inlined_call_operand.vmem [shape: f32[1,32], index: 7, kind: input, shape index: {}]   ;;  %s1884_s8 = inlined_call_operand.vmem [shape: f32[32,32], index: 8, kind: input, shape index: {}]   ;;  %s1885_s9 = inlined_call_operand.vmem [shape: f32[1,32], index: 9, kind: input, shape index: {}]   ;;  %s1886_s10 = inlined_call_operand.vmem [shape: f32[64,8], index: 10, kind: input, shape index: {}]   ;;  %s1887_s11 = inlined_call_operand.vmem [shape: f32[1,8], index: 11, kind: input, shape index: {}]   ;;  %s1888_s12 = inlined_call_operand.vmem [shape: f32[1,64], index: 12, kind: input, shape index: {}]   ;;  %s1889_s13 = inlined_call_operand.vmem [shape: f32[1,64], index: 13, kind: input, shape index: {}]   ;;  %s1890_s14 = inlined_call_operand.vmem [shape: f32[128,8], index: 14, kind: output, shape index: {}]  }
   0x1   :  { %20 = vsyncpa [#allocation5], 0  ;;  %s1637_s29 = smov 0  }
   0x2 LB: > { %s1387_s30 = sadd.s32 4294967295, %s1557_s29   ;;  %p1389_p0 = scmp.ge.s32.totalorder %s1557_s29, 1  ;;  %s1557_s29 = sphi %s1637_s29, %s26_s29  }
   0x3   : > { %p371_p1 = scmp.lt.s32.totalorder %s1557_s29, 5  ;;  %s383_s17 = sshll.u32 %s1876_s0, 4  ;;  %s384_s17 = int_to_ptr.vmem [resolvable:$true] %s383_s17 }
   0x4   : > { %p1648_p3 = scmp.eq.s32.totalorder %s1387_s30, 0  ;;  %s393_s21 = sshll.u32 %s1877_s1, 4  ;;  %s394_s21 = int_to_ptr.vmem [resolvable:$true] %s393_s21 }
   0x5   : > { %p372_p2 = pnand %p1389_p0, %p371_p1  ;;  %s1559_s22 = smov [#allocation2]  }
   0x6   : > { %s1560_s23 = smov [#allocation4]  }
   0x7   : > { %p1438_p4 = pneg %p372_p2 }
   0x8   : > { %466 = sbr.rel (%p372_p2) target bundleno = 620 (0x26c), region = 76 }
   0x9   : > { %p1439_p5 = pnand %p1648_p3, %p1438_p4 }
   0xb   : > { %1441 = dma.vmem_to_smem (!%p1439_p5), %s384_s17, 16, %s1559_s22, [#allocation3]  }
   0xc   : > { %1444 = dma.vmem_to_smem (!%p1439_p5), %s394_s21, 16, %s1560_s23, [#allocation5]  }
   0xd   : > { %1548 = dma.done.wait (%p1648_p3), [#allocation3], 16  }
   0xe   : > { %1550 = vsyncadd (%p1648_p3), [#allocation3], 4294967280 }
   0xf   : > { %1552 = dma.done.wait (%p1648_p3), [#allocation5], 16  }
  0x10   : > { %1554 = vsyncadd (%p1648_p3), [#allocation5], 4294967280 }
  0x11   : > { %478 = sfence }
  0x12   : > { %v741_v0 = vld [vmem:[%s1882_s6 + $0x8] sm:$0xff]  ;;  %v740_v1 = vld [vmem:[%s1882_s6] sm:$0xff]  ;;  %s1396_s28 = sshll.u32 %s1387_s30, 2  ;;  %s572_s30 = sld [smem:[#allocation2]] }
  0x13   : > { %773 = vmatpush.msra.mxu0 %v741_v0  ;;  %p535_p6 = scmp.lt.s32.totalorder %s1396_s28, 15  ;;  %s573_s19 = sld [smem:[#allocation4]] }
  0x14   : > { %s1410_s26 = sld [smem:[#allocation2 + $0x1]] }
  0x15   : > { %774 = vmatpush.msra.mxu0 %v740_v1  ;;  %s1907_s28 = smov (!%p535_p6, %s1396_s28), 15  ;;  %s1411_s21 = sld [smem:[#allocation4 + $0x1]] }
  0x16   : > { %s1671_s15 = sshll.u32 %s1907_s28, 3 }
  0x17   : > { %s544_s18 = scalar_lea.vmem %s1879_s3, %s1671_s15  ;;  %s1735_s22 = scalar_lea.vmem %s1878_s2, %s1671_s15 }
  0x18   : > { %v568_v2 = vld [vmem:[%s544_s18] sm:$0xff]  ;;  %v569_v3 = vld [vmem:[%s544_s18 + $0x8] sm:$0xff]  ;;  %v1677_v4 = vld [vmem:[%s544_s18 + $0x10] sm:$0xff]  ;;  %s550_s25 = scalar_lea.vmem %s1880_s4, %s1671_s15  ;;  %s1820_s27 = scalar_lea.vmem %s1881_s5, %s1671_s15 }
  0x19   : > { %v1679_v5 = vld [vmem:[%s544_s18 + $0x18] sm:$0xff]  ;;  %v578_v6 = vsub.f32 1.0, %v568_v2  ;;  %v579_v7 = vsub.f32 1.0, %v569_v3  ;;  %v580_v8 = vsub.f32 1.0, %v1677_v4  ;;  %v574_v16 = vadd.f32 1e-07, %v568_v2 }
  0x1a   : > { %v581_v9 = vsub.f32 1.0, %v1679_v5  ;;  %v575_v17 = vadd.f32 1e-07, %v569_v3  ;;  %v576_v55 = vadd.f32 1e-07, %v1677_v4  ;;  %v564_v45 = vld [vmem:[%s1735_s22] sm:$0xff] }
  0x1b   : > { %v582_v10 = vadd.f32 1e-07, %v578_v6  ;;  %v583_v11 = vadd.f32 1e-07, %v579_v7  ;;  %v584_v12 = vadd.f32 1e-07, %v580_v8  ;;  %v662_v7 = vstv %s572_s30 }
  0x1c   : > { %v1683_v13 = vadd.f32 1e-07, %v581_v9  ;;  %v577_v3 = vadd.f32 1e-07, %v1679_v5 }
  0x1d   : > { %1465 = vrcp.f32 %v582_v10  ;;  %v595_v14 = vand.u32 2147483647, %v582_v10  ;;  %vm591_vm0 = vweird.f32 %v582_v10  ;;  %v597_v20 = vand.u32 2147483648, %v582_v10 }
  0x1e   : > { %1467 = vrcp.f32 %v583_v11  ;;  %vm606_vm1 = vweird.f32 %v583_v11  ;;  %v610_v24 = vand.u32 2147483647, %v583_v11  ;;  %v612_v25 = vand.u32 2147483648, %v583_v11 }
  0x1f   : > { %1469 = vrcp.f32 %v584_v12  ;;  %vm1686_vm2 = vcmp.eq.f32.partialorder %v595_v14, 8.507059e+37  ;;  %vm621_vm4 = vweird.f32 %v584_v12  ;;  %v627_v30 = vand.u32 2147483648, %v584_v12 }
  0x20   : > { %1471 = vrcp.f32 %v1683_v13  ;;  %v625_v34 = vand.u32 2147483647, %v584_v12  ;;  %v598_v36 = vor.u32 1.1754944e-38, %v597_v20  ;;  %vm1696_vm8 = vcmp.eq.f32.partialorder %v610_v24, 8.507059e+37 }
  0x21   : > { %v613_v42 = vor.u32 1.1754944e-38, %v612_v25  ;;  %vm636_vm10 = vweird.f32 %v1683_v13  ;;  %v628_v46 = vor.u32 1.1754944e-38, %v627_v30  ;;  %v642_v50 = vand.u32 2147483648, %v1683_v13 }
  0x22   : > { %vm626_vm13 = vcmp.eq.f32.partialorder %v625_v34, 8.507059e+37  ;;  %v640_v54 = vand.u32 2147483647, %v1683_v13 }
  0x23   : > { %v1466_v15 = vpop.eup %1465  ;;  %v643_v62 = vor.u32 1.1754944e-38, %v642_v50 }
  0x24   : > { %v1468_v18 = vpop.eup %1467  ;;  %v587_v19 = vmul.f32 %v1466_v15, %v582_v10  ;;  %vm592_vm3 = vweird.f32 %v1466_v15  ;;  %vm641_vm15 = vcmp.eq.f32.partialorder %v640_v54, 8.507059e+37 }
  0x25   : > { %v1470_v21 = vpop.eup %1469  ;;  %v602_v23 = vmul.f32 %v1468_v18, %v583_v11  ;;  %vm607_vm5 = vweird.f32 %v1468_v18  ;;  %vm1692_vm7 = vmor %vm591_vm0, %vm592_vm3 }
  0x26   : > { %v1472_v26 = vpop.eup %1471  ;;  %v588_v27 = vsub.f32 1.0, %v587_v19  ;;  %v617_v28 = vmul.f32 %v1470_v21, %v584_v12  ;;  %vm622_vm6 = vweird.f32 %v1470_v21  ;;  %vm1701_vm9 = vmor %vm606_vm1, %vm607_vm5 }
  0x27   : > { %v603_v29 = vsub.f32 1.0, %v602_v23  ;;  %v632_v31 = vmul.f32 %v1472_v26, %v1683_v13  ;;  %vm1707_vm11 = vmor %vm621_vm4, %vm622_vm6  ;;  %vm637_vm12 = vweird.f32 %v1472_v26  ;;  %vm746_vm6 = vcmask 130048  }
  0x28   : > { %v589_v32 = vmul.f32 %v1466_v15, %v588_v27  ;;  %v618_v33 = vsub.f32 1.0, %v617_v28  ;;  %vm638_vm14 = vmor %vm636_vm10, %vm637_vm12 }
  0x29   : > { %v604_v37 = vmul.f32 %v1468_v18, %v603_v29  ;;  %v633_v39 = vsub.f32 1.0, %v632_v31 }
  0x2a   : > { %v590_v40 = vadd.f32 %v1466_v15, %v589_v32  ;;  %v619_v43 = vmul.f32 %v1470_v21, %v618_v33 }
  0x2b   : > { %v605_v44 = vadd.f32 %v1468_v18, %v604_v37  ;;  %v634_v47 = vmul.f32 %v1472_v26, %v633_v39  ;;  %v731_v37 = vstv %s573_s19 }
  0x2c   : > { %v594_v48 = vsel %vm1692_vm7, %v1466_v15, %v590_v40  ;;  %v620_v49 = vadd.f32 %v1470_v21, %v619_v43 }
  0x2d   : > { %v599_v51 = vsel %vm1686_vm2, %v598_v36, %v594_v48  ;;  %v609_v52 = vsel %vm1701_vm9, %v1468_v18, %v605_v44  ;;  %v635_v53 = vadd.f32 %v1472_v26, %v634_v47 }
  0x2e   : > { %v600_v56 = vmul.f32 %v599_v51, %v574_v16  ;;  %v614_v57 = vsel %vm1696_vm8, %v613_v42, %v609_v52  ;;  %v624_v58 = vsel %vm1707_vm11, %v1470_v21, %v620_v49 }
  0x2f   : > { %v615_v59 = vmul.f32 %v614_v57, %v575_v17  ;;  %v629_v60 = vsel %vm626_vm13, %v628_v46, %v624_v58  ;;  %v639_v0 = vsel %vm638_vm14, %v1472_v26, %v635_v53 }
  0x30   : > { %v646_v61 = vmul.f32 %v600_v56, %v600_v56  ;;  %v630_v2 = vmul.f32 %v629_v60, %v576_v55  ;;  %v644_v6 = vsel %vm641_vm15, %v643_v62, %v639_v0  ;;  %v565_v62 = vld [vmem:[%s1735_s22 + $0x8] sm:$0xff] }
  0x31   : > { %v647_v63 = vmul.f32 %v615_v59, %v615_v59  ;;  %v645_v11 = vmul.f32 %v644_v6, %v577_v3 }
  0x32   : > { %v650_v1 = vmul.f32 %v646_v61, %v646_v61  ;;  %v648_v10 = vmul.f32 %v630_v2, %v630_v2 }
  0x33   : > { %v651_v8 = vmul.f32 %v647_v63, %v647_v63  ;;  %v649_v17 = vmul.f32 %v645_v11, %v645_v11 }
  0x34   : > { %v654_v4 = vmul.f32 %v650_v1, %v650_v1  ;;  %v652_v15 = vmul.f32 %v648_v10, %v648_v10 }
  0x35   : > { %v655_v13 = vmul.f32 %v651_v8, %v651_v8  ;;  %v653_v20 = vmul.f32 %v649_v17, %v649_v17 }
  0x36   : > { %v658_v9 = vmul.f32 %v654_v4, %v646_v61  ;;  %v656_v19 = vmul.f32 %v652_v15, %v652_v15 }
  0x37   : > { %v659_v16 = vmul.f32 %v655_v13, %v647_v63  ;;  %v657_v5 = vmul.f32 %v653_v20, %v653_v20  ;;  %v792_v20 = vld [vmem:[%s550_s25] sm:$0xff] }
  0x38   : > { %v663_v12 = vmul.f32 %v662_v7, %v658_v9  ;;  %v660_v22 = vmul.f32 %v656_v19, %v648_v10 }
  0x39   : > { %v664_v18 = vmul.f32 %v662_v7, %v659_v16  ;;  %v661_v25 = vmul.f32 %v657_v5, %v649_v17  ;;  %v793_v5 = vld [vmem:[%s550_s25 + $0x8] sm:$0xff] }
  0x3a   : > { %v667_v14 = vadd.f32 1.0, %v663_v12  ;;  %v665_v24 = vmul.f32 %v662_v7, %v660_v22  ;;  %v566_v12 = vld [vmem:[%s1735_s22 + $0x10] sm:$0xff] }
  0x3b   : > { %v668_v21 = vadd.f32 1.0, %v664_v18  ;;  %v666_v29 = vmul.f32 %v662_v7, %v661_v25  ;;  %v567_v18 = vld [vmem:[%s1735_s22 + $0x18] sm:$0xff]  ;;  %v794_v25 = vld [vmem:[%s550_s25 + $0x10] sm:$0xff]  ;;  %s1561_s22 = smov 32  }
  0x3c   : > { %1473 = vrcp.f32 %v667_v14  ;;  %v682_v27 = vand.u32 2147483648, %v667_v14  ;;  %v669_v28 = vadd.f32 1.0, %v665_v24  ;;  %vm676_vm0 = vweird.f32 %v667_v14 }
  0x3d   : > { %1475 = vrcp.f32 %v668_v21  ;;  %v680_v31 = vand.u32 2147483647, %v667_v14  ;;  %v670_v34 = vadd.f32 1.0, %v666_v29  ;;  %v697_v40 = vand.u32 2147483648, %v668_v21 }
  0x3e   : > { %1477 = vrcp.f32 %v669_v28  ;;  %v683_v36 = vor.u32 1.1754944e-38, %v682_v27  ;;  %vm691_vm4 = vweird.f32 %v668_v21  ;;  %v695_v42 = vand.u32 2147483647, %v668_v21 }
  0x3f   : > { %vm681_vm3 = vcmp.eq.f32.partialorder %v680_v31, 8.507059e+37  ;;  %1479 = vrcp.f32 %v670_v34  ;;  %v698_v50 = vor.u32 1.1754944e-38, %v697_v40  ;;  %vm706_vm9 = vweird.f32 %v669_v28  ;;  %v1757_v31 = vld [vmem:[%s550_s25 + $0x18] sm:$0xff] }
  0x40   : > { %vm696_vm8 = vcmp.eq.f32.partialorder %v695_v42, 8.507059e+37  ;;  %v712_v53 = vand.u32 2147483648, %v669_v28  ;;  %v710_v57 = vand.u32 2147483647, %v669_v28  ;;  %vm721_vm13 = vweird.f32 %v670_v34 }
  0x41   : > { %v727_v8 = vand.u32 2147483648, %v670_v34  ;;  %v725_v10 = vand.u32 2147483647, %v670_v34  ;;  %v804_v27 = vsub.f32 1.0, %v794_v25 }
  0x42   : > { %v1474_v23 = vpop.eup %1473  ;;  %v713_v0 = vor.u32 1.1754944e-38, %v712_v53  ;;  %vm711_vm12 = vcmp.eq.f32.partialorder %v710_v57, 8.507059e+37  ;;  %v799_v53 = vadd.f32 1e-07, %v793_v5 }
  0x43   : > { %v672_v26 = vmul.f32 %v1474_v23, %v667_v14  ;;  %vm677_vm1 = vweird.f32 %v1474_v23  ;;  %v1476_v32 = vpop.eup %1475  ;;  %v728_v13 = vor.u32 1.1754944e-38, %v727_v8 }
  0x44   : > { %vm1727_vm2 = vmor %vm676_vm0, %vm677_vm1  ;;  %v687_v38 = vmul.f32 %v1476_v32, %v668_v21  ;;  %vm692_vm5 = vweird.f32 %v1476_v32  ;;  %v1478_v44 = vpop.eup %1477  ;;  %vm726_vm0 = vcmp.eq.f32.partialorder %v725_v10, 8.507059e+37  ;;  %v802_v21 = vsub.f32 1.0, %v792_v20 }
  0x45   : > { %v673_v30 = vsub.f32 1.0, %v672_v26  ;;  %vm1740_vm7 = vmor %vm691_vm4, %vm692_vm5  ;;  %v702_v51 = vmul.f32 %v1478_v44, %v669_v28  ;;  %v1480_v54 = vpop.eup %1479  ;;  %vm707_vm10 = vweird.f32 %v1478_v44 }
  0x46   : > { %v688_v41 = vsub.f32 1.0, %v687_v38  ;;  %v717_v59 = vmul.f32 %v1480_v54, %v670_v34  ;;  %vm708_vm11 = vmor %vm706_vm9, %vm707_vm10  ;;  %vm722_vm14 = vweird.f32 %v1480_v54  ;;  %v806_v22 = vadd.f32 1e-07, %v802_v21 }
  0x47   : > { %v674_v33 = vmul.f32 %v1474_v23, %v673_v30  ;;  %v703_v56 = vsub.f32 1.0, %v702_v51  ;;  %vm723_vm15 = vmor %vm721_vm13, %vm722_vm14  ;;  %v808_v30 = vadd.f32 1e-07, %v804_v27  ;;  %v805_v38 = vsub.f32 1.0, %v1757_v31 }
  0x48   : > { %v689_v47 = vmul.f32 %v1476_v32, %v688_v41  ;;  %v718_v1 = vsub.f32 1.0, %v717_v59  ;;  %1481 = vrcp.f32 %v806_v22  ;;  %v821_v34 = vand.u32 2147483648, %v806_v22 }
  0x49   : > { %v675_v39 = vadd.f32 %v1474_v23, %v674_v33  ;;  %v704_v61 = vmul.f32 %v1478_v44, %v703_v56  ;;  %vm815_vm1 = vweird.f32 %v806_v22  ;;  %vm845_vm9 = vweird.f32 %v808_v30 }
  0x4a   : > { %v690_v52 = vadd.f32 %v1476_v32, %v689_v47  ;;  %v719_v3 = vmul.f32 %v1480_v54, %v718_v1  ;;  %v849_v1 = vand.u32 2147483647, %v808_v30 }
  0x4b   : > { %v679_v43 = vsel %vm1727_vm2, %v1474_v23, %v675_v39  ;;  %v705_v2 = vadd.f32 %v1478_v44, %v704_v61  ;;  %v803_v23 = vsub.f32 1.0, %v793_v5  ;;  %v822_v39 = vor.u32 1.1754944e-38, %v821_v34  ;;  %v964_v34 = vld [vmem:[%s1884_s8] sm:$0xff] }
  0x4c   : > { %v684_v46 = vsel %vm681_vm3, %v683_v36, %v679_v43  ;;  %v694_v58 = vsel %vm1740_vm7, %v1476_v32, %v690_v52  ;;  %v720_v9 = vadd.f32 %v1480_v54, %v719_v3  ;;  %v819_v36 = vand.u32 2147483647, %v806_v22 }
  0x4d   : > { %v732_v48 = vmul.f32 %v731_v37, %v684_v46  ;;  %v699_v60 = vsel %vm696_vm8, %v698_v50, %v694_v58  ;;  %v709_v6 = vsel %vm708_vm11, %v1478_v44, %v705_v2  ;;  %v807_v24 = vadd.f32 1e-07, %v803_v23 }
  0x4e   : > { %v733_v63 = vmul.f32 %v731_v37, %v699_v60  ;;  %v714_v7 = vsel %vm711_vm12, %v713_v0, %v709_v6  ;;  %v724_v14 = vsel %vm723_vm15, %v1480_v54, %v720_v9  ;;  %v1482_v26 = vpop.eup %1481  ;;  %vm820_vm4 = vcmp.eq.f32.partialorder %v819_v36, 8.507059e+37 }
  0x4f   : > { %v736_v55 = vmul.f32 %v732_v48, %v564_v45  ;;  %v734_v11 = vmul.f32 %v731_v37, %v714_v7  ;;  %v729_v16 = vsel %vm726_vm0, %v728_v13, %v724_v14  ;;  %1483 = vrcp.f32 %v807_v24 }
  0x50   : > { %v737_v4 = vmul.f32 %v733_v63, %v565_v62  ;;  %v735_v17 = vmul.f32 %v731_v37, %v729_v16  ;;  %v811_v28 = vmul.f32 %v1482_v26, %v806_v22  ;;  %vm816_vm2 = vweird.f32 %v1482_v26 }
  0x51   : > { %1406 = vmatmul.msk.f32.vlgmr.msra.gmra.mxu0 %vm746_vm6, %v736_v55  ;;  %v738_v15 = vmul.f32 %v734_v11, %v566_v12  ;;  %v798_v37 = vadd.f32 1e-07, %v792_v20  ;;  %1485 = vrcp.f32 %v808_v30  ;;  %vm817_vm3 = vmor %vm815_vm1, %vm816_vm2  ;;  %v809_v44 = vadd.f32 1e-07, %v805_v38 }
  0x52   : > { %v739_v19 = vmul.f32 %v735_v17, %v567_v18  ;;  %v812_v29 = vsub.f32 1.0, %v811_v28  ;;  %v836_v48 = vand.u32 2147483648, %v807_v24  ;;  %vm830_vm5 = vweird.f32 %v807_v24  ;;  %v967_v28 = vld [vmem:[%s1884_s8 + $0x18] sm:$0xff] }
  0x53   : > { %1487 = vrcp.f32 %v809_v44  ;;  %v834_v51 = vand.u32 2147483647, %v807_v24  ;;  %v851_v62 = vand.u32 2147483648, %v808_v30  ;;  %v800_v3 = vadd.f32 1e-07, %v794_v25  ;;  %997 = vmatpush.msra.mxu1 %v967_v28 }
  0x54   : > { %v813_v32 = vmul.f32 %v1482_v26, %v812_v29  ;;  %v837_v52 = vor.u32 1.1754944e-38, %v836_v48  ;;  %vm850_vm12 = vcmp.eq.f32.partialorder %v849_v1, 8.507059e+37  ;;  %v886_v11 = vstv %s1410_s26  ;;  %v966_v29 = vld [vmem:[%s1884_s8 + $0x10] sm:$0xff]  ;;  %s562_s26 = scalar_lea.vmem %s1890_s14, %s1671_s15 }
  0x55   : > { %v1484_v33 = vpop.eup %1483  ;;  %vm835_vm8 = vcmp.eq.f32.partialorder %v834_v51, 8.507059e+37  ;;  %v852_v2 = vor.u32 1.1754944e-38, %v851_v62  ;;  %vm860_vm13 = vweird.f32 %v809_v44  ;;  %v864_v17 = vand.u32 2147483647, %v809_v44  ;;  %998 = vmatpush.msra.mxu1 %v966_v29 }
  0x56   : > { %v814_v35 = vadd.f32 %v1482_v26, %v813_v32  ;;  %v826_v41 = vmul.f32 %v1484_v33, %v807_v24  ;;  %v801_v18 = vadd.f32 1e-07, %v1757_v31 }
  0x57   : > { %v1486_v47 = vpop.eup %1485  ;;  %vm865_vm0 = vcmp.eq.f32.partialorder %v864_v17, 8.507059e+37 }
  0x58   : > { %v818_v40 = vsel %vm817_vm3, %v1482_v26, %v814_v35  ;;  %v827_v43 = vsub.f32 1.0, %v826_v41  ;;  %v841_v55 = vmul.f32 %v1486_v47, %v808_v30  ;;  %vm846_vm10 = vweird.f32 %v1486_v47 }
  0x59   : > { %1407 = vmatmul.msk.f32.gmra.mxu0 %vm746_vm6, %v737_v4  ;;  %v823_v42 = vsel %vm820_vm4, %v822_v39, %v818_v40  ;;  %v1488_v61 = vpop.eup %1487  ;;  %vm847_vm11 = vmor %vm845_vm9, %vm846_vm10  ;;  %vm972_vm9 = vcmask 261120  }
  0x5a   : > { %v824_v45 = vmul.f32 %v823_v42, %v798_v37  ;;  %v828_v46 = vmul.f32 %v1484_v33, %v827_v43  ;;  %v842_v57 = vsub.f32 1.0, %v841_v55  ;;  %v856_v7 = vmul.f32 %v1488_v61, %v809_v44 }
  0x5b   : > { %vm861_vm14 = vweird.f32 %v1488_v61 }
  0x5c   : > { %v829_v49 = vadd.f32 %v1484_v33, %v828_v46  ;;  %v870_v50 = vmul.f32 %v824_v45, %v824_v45  ;;  %v843_v60 = vmul.f32 %v1486_v47, %v842_v57  ;;  %v857_v9 = vsub.f32 1.0, %v856_v7  ;;  %vm862_vm15 = vmor %vm860_vm13, %vm861_vm14 }
  0x5e   : > { %v874_v58 = vmul.f32 %v870_v50, %v870_v50  ;;  %v844_v63 = vadd.f32 %v1486_v47, %v843_v60  ;;  %v858_v14 = vmul.f32 %v1488_v61, %v857_v9 }
  0x60   : > { %v878_v0 = vmul.f32 %v874_v58, %v874_v58  ;;  %v848_v6 = vsel %vm847_vm11, %v1486_v47, %v844_v63  ;;  %v859_v16 = vadd.f32 %v1488_v61, %v858_v14 }
  0x61   : > { %1408 = vmatmul.msk.f32.gmra.mxu0 %vm746_vm6, %v738_v15  ;;  %v853_v8 = vsel %vm850_vm12, %v852_v2, %v848_v6  ;;  %v866_v15 = vand.u32 2147483648, %v809_v44 }
  0x62   : > { %v882_v10 = vmul.f32 %v878_v0, %v870_v50  ;;  %v854_v13 = vmul.f32 %v853_v8, %v800_v3  ;;  %v863_v5 = vsel %vm862_vm15, %v1488_v61, %v859_v16  ;;  %v955_v61 = vstv %s1411_s21 }
  0x63   : > { %v867_v20 = vor.u32 1.1754944e-38, %v866_v15 }
  0x64   : > { %v872_v22 = vmul.f32 %v854_v13, %v854_v13 }
  0x65   : > { %v868_v23 = vsel %vm865_vm0, %v867_v20, %v863_v5 }
  0x66   : > { %v876_v26 = vmul.f32 %v872_v22, %v872_v22  ;;  %v869_v27 = vmul.f32 %v868_v23, %v801_v18 }
  0x68   : > { %v880_v31 = vmul.f32 %v876_v26, %v876_v26  ;;  %v873_v32 = vmul.f32 %v869_v27, %v869_v27 }
  0x69   : > { %1409 = vmatmul.msk.f32.gmra.mxu0 %vm746_vm6, %v739_v19  ;;  %vm831_vm6 = vweird.f32 %v1484_v33  ;;  %v887_v19 = vmul.f32 %v886_v11, %v882_v10 }
  0x6a   : > { %vm832_vm7 = vmor %vm830_vm5, %vm831_vm6  ;;  %v884_v36 = vmul.f32 %v880_v31, %v872_v22  ;;  %v877_v37 = vmul.f32 %v873_v32, %v873_v32 }
  0x6b   : > { %v833_v54 = vsel %vm832_vm7, %v1484_v33, %v829_v49  ;;  %v891_v24 = vadd.f32 1.0, %v887_v19  ;;  %v965_v33 = vld [vmem:[%s1884_s8 + $0x8] sm:$0xff] }
  0x6c   : > { %v838_v56 = vsel %vm835_vm8, %v837_v52, %v833_v54  ;;  %999 = vmatpush.msra.mxu1 %v965_v33  ;;  %v889_v39 = vmul.f32 %v886_v11, %v884_v36  ;;  %v881_v40 = vmul.f32 %v877_v37, %v877_v37 }
  0x6d   : > { %v839_v59 = vmul.f32 %v838_v56, %v799_v53  ;;  %1489 = vrcp.f32 %v891_v24  ;;  %vm900_vm1 = vweird.f32 %v891_v24  ;;  %v906_v49 = vand.u32 2147483648, %v891_v24 }
  0x6e   : > { %1000 = vmatpush.msra.mxu1 %v964_v34  ;;  %v893_v42 = vadd.f32 1.0, %v889_v39  ;;  %v885_v43 = vmul.f32 %v881_v40, %v873_v32  ;;  %v904_v52 = vand.u32 2147483647, %v891_v24 }
  0x6f   : > { %v871_v4 = vmul.f32 %v839_v59, %v839_v59  ;;  %v907_v55 = vor.u32 1.1754944e-38, %v906_v49  ;;  %v1460_v59 = vld [vmem:[%s1883_s7] ss:$0 sm:$0xff] }
  0x70   : > { %v890_v46 = vmul.f32 %v886_v11, %v885_v43  ;;  %vm905_vm4 = vcmp.eq.f32.partialorder %v904_v52, 8.507059e+37  ;;  %vm930_vm10 = vweird.f32 %v893_v42  ;;  %v936_v14 = vand.u32 2147483648, %v893_v42  ;;  %v1221_v43 = vld [vmem:[%s1886_s10 + $0x38] sm:$0xff] }
  0x71   : > { %v875_v12 = vmul.f32 %v871_v4, %v871_v4  ;;  %v934_v16 = vand.u32 2147483647, %v893_v42  ;;  %1247 = vmatpush.msra.mxu2 %v1221_v43  ;;  %1422 = vmatpush.msra.mxu3 %v1221_v43 }
  0x72   : > { %v1773_v50 = vadd.f32 1.0, %v890_v46 }
  0x73   : > { %v879_v21 = vmul.f32 %v875_v12, %v875_v12  ;;  %v1490_v38 = vpop.eup %1489  ;;  %vm935_vm13 = vcmp.eq.f32.partialorder %v934_v16, 8.507059e+37 }
  0x74   : > { %v896_v41 = vmul.f32 %v1490_v38, %v891_v24  ;;  %vm901_vm2 = vweird.f32 %v1490_v38  ;;  %vm945_vm14 = vweird.f32 %v1773_v50  ;;  %v951_v26 = vand.u32 2147483648, %v1773_v50 }
  0x75   : > { %v883_v25 = vmul.f32 %v879_v21, %v871_v4  ;;  %vm902_vm3 = vmor %vm900_vm1, %vm901_vm2  ;;  %v937_v21 = vor.u32 1.1754944e-38, %v936_v14  ;;  %v949_v28 = vand.u32 2147483647, %v1773_v50  ;;  %v1041_v14 = vld [vmem:[%s1820_s27 + $0x18] sm:$0xff] }
  0x76   : > { %v897_v44 = vsub.f32 1.0, %v896_v41  ;;  %v952_v32 = vor.u32 1.1754944e-38, %v951_v26 }
  0x77   : > { %v888_v30 = vmul.f32 %v886_v11, %v883_v25  ;;  %vm950_vm1 = vcmp.eq.f32.partialorder %v949_v28, 8.507059e+37 }
  0x78   : > { %v898_v47 = vmul.f32 %v1490_v38, %v897_v44  ;;  %v1220_v44 = vld [vmem:[%s1886_s10 + $0x30] sm:$0xff] }
  0x79   : > { %v892_v35 = vadd.f32 1.0, %v888_v30  ;;  %1248 = vmatpush.msra.mxu2 %v1220_v44  ;;  %1423 = vmatpush.msra.mxu3 %v1220_v44 }
  0x7a   : > { %v899_v51 = vadd.f32 %v1490_v38, %v898_v47 }
  0x7b   : > { %1491 = vrcp.f32 %v892_v35  ;;  %vm915_vm5 = vweird.f32 %v892_v35  ;;  %v919_v62 = vand.u32 2147483647, %v892_v35  ;;  %v921_v63 = vand.u32 2147483648, %v892_v35 }
  0x7c   : > { %1493 = vrcp.f32 %v893_v42  ;;  %v903_v56 = vsel %vm902_vm3, %v1490_v38, %v899_v51  ;;  %v1216_v51 = vld [vmem:[%s1886_s10 + $0x10] sm:$0xff] }
  0x7d   : > { %1495 = vrcp.f32 %v1773_v50  ;;  %v908_v60 = vsel %vm905_vm4, %v907_v55, %v903_v56  ;;  %vm920_vm8 = vcmp.eq.f32.partialorder %v919_v62, 8.507059e+37  ;;  %v922_v7 = vor.u32 1.1754944e-38, %v921_v63  ;;  %v1038_v55 = vld [vmem:[%s1820_s27] sm:$0xff] }
  0x7e   : > { %v956_v6 = vmul.f32 %v955_v61, %v908_v60 }
  0x81   : > { %v1492_v45 = vpop.eup %1491 }
  0x82   : > { %v911_v48 = vmul.f32 %v1492_v45, %v892_v35  ;;  %v1494_v54 = vpop.eup %1493  ;;  %vm916_vm6 = vweird.f32 %v1492_v45 }
  0x83   : > { %v926_v58 = vmul.f32 %v1494_v54, %v893_v42  ;;  %v1496_v2 = vpop.eup %1495  ;;  %vm917_vm7 = vmor %vm915_vm5, %vm916_vm6  ;;  %vm931_vm11 = vweird.f32 %v1494_v54  ;;  %v1461_v42 = vld [vmem:[%s1885_s9] ss:$0 sm:$0xff] }
  0x84   : > { %v912_v53 = vsub.f32 1.0, %v911_v48  ;;  %v941_v11 = vmul.f32 %v1496_v2, %v1773_v50  ;;  %vm932_vm12 = vmor %vm930_vm10, %vm931_vm11  ;;  %vm946_vm15 = vweird.f32 %v1496_v2  ;;  %v1218_v48 = vld [vmem:[%s1886_s10 + $0x20] sm:$0xff]  ;;  %v1217_v50 = vld [vmem:[%s1886_s10 + $0x18] sm:$0xff] }
  0x85   : > { %v927_v1 = vsub.f32 1.0, %v926_v58  ;;  %vm947_vm0 = vmor %vm945_vm14, %vm946_vm15  ;;  %v1048_v58 = vsub.f32 1.0, %v1038_v55 }
  0x86   : > { %v913_v57 = vmul.f32 %v1492_v45, %v912_v53  ;;  %v942_v17 = vsub.f32 1.0, %v941_v11 }
  0x87   : > { %v928_v10 = vmul.f32 %v1494_v54, %v927_v1  ;;  %v1052_v60 = vadd.f32 1e-07, %v1048_v58  ;;  %v1039_v1 = vld [vmem:[%s1820_s27 + $0x8] sm:$0xff] }
  0x88   : > { %v914_v0 = vadd.f32 %v1492_v45, %v913_v57  ;;  %v943_v23 = vmul.f32 %v1496_v2, %v942_v17 }
  0x89   : > { %v929_v15 = vadd.f32 %v1494_v54, %v928_v10  ;;  %1497 = vrcp.f32 %v1052_v60  ;;  %vm1061_vm2 = vweird.f32 %v1052_v60  ;;  %v1067_v10 = vand.u32 2147483648, %v1052_v60 }
  0x8a   : > { %v918_v9 = vsel %vm917_vm7, %v1492_v45, %v914_v0  ;;  %v944_v27 = vadd.f32 %v1496_v2, %v943_v23  ;;  %v1219_v45 = vld [vmem:[%s1886_s10 + $0x28] sm:$0xff] }
  0x8b   : > { %v923_v13 = vsel %vm920_vm8, %v922_v7, %v918_v9  ;;  %v933_v5 = vsel %vm932_vm12, %v1494_v54, %v929_v15  ;;  %1249 = vmatpush.msra.mxu2 %v1219_v45  ;;  %1424 = vmatpush.msra.mxu3 %v1219_v45  ;;  %v1040_v7 = vld [vmem:[%s1820_s27 + $0x10] sm:$0xff]  ;;  %v1068_v16 = vor.u32 1.1754944e-38, %v1067_v10 }
  0x8c   : > { %v957_v20 = vmul.f32 %v955_v61, %v923_v13  ;;  %v938_v25 = vsel %vm935_vm13, %v937_v21, %v933_v5  ;;  %v948_v34 = vsel %vm947_vm0, %v1496_v2, %v944_v27  ;;  %v1050_v9 = vsub.f32 1.0, %v1040_v7 }
  0x8d   : > { %v958_v31 = vmul.f32 %v955_v61, %v938_v25  ;;  %v953_v36 = vsel %vm950_vm1, %v952_v32, %v948_v34  ;;  %1250 = vmatpush.msra.mxu2 %v1218_v48  ;;  %1425 = vmatpush.msra.mxu3 %v1218_v48 }
  0x8e   : > { %v959_v39 = vmul.f32 %v955_v61, %v953_v36  ;;  %v1054_v13 = vadd.f32 1e-07, %v1050_v9 }
  0x8f   : > { %1251 = vmatpush.msra.mxu2 %v1217_v50  ;;  %1426 = vmatpush.msra.mxu3 %v1217_v50  ;;  %v1498_v0 = vpop.eup %1497 }
  0x90   : > { %v1057_v2 = vmul.f32 %v1498_v0, %v1052_v60  ;;  %vm1062_vm3 = vweird.f32 %v1498_v0  ;;  %vm1091_vm11 = vweird.f32 %v1054_v13  ;;  %v1095_v43 = vand.u32 2147483647, %v1054_v13 }
  0x91   : > { %1252 = vmatpush.msra.mxu2 %v1216_v51  ;;  %1427 = vmatpush.msra.mxu3 %v1216_v51  ;;  %vm1063_vm4 = vmor %vm1061_vm2, %vm1062_vm3 }
  0x92   : > { %vm1096_vm14 = vcmp.eq.f32.partialorder %v1095_v43, 8.507059e+37  ;;  %v1463_v43 = vld [vmem:[%s1889_s13] ss:$0 sm:$0xff] }
  0xce   : > { %v776_v3 = vpop.f32.mrf.mxu0 }
  0xcf   : > { %v777_v4 = vadd.f32 %v1460_v59, %v776_v3  ;;  %v1049_v3 = vsub.f32 1.0, %v1039_v1 }
  0xd1   : > { %v788_v8 = vmax.f32 %v777_v4, 0.0  ;;  %v1058_v4 = vsub.f32 1.0, %v1057_v2  ;;  %v1047_v2 = vadd.f32 1e-07, %v1041_v14 }
  0xd3   : > { %v960_v12 = vmul.f32 %v956_v6, %v788_v8  ;;  %v1053_v6 = vadd.f32 1e-07, %v1049_v3  ;;  %v1059_v8 = vmul.f32 %v1498_v0, %v1058_v4 }
  0xd5   : > { %1412 = vmatmul.msk.f32.vlgmr.msra.gmra.mxu1 %vm972_vm9, %v960_v12  ;;  %1499 = vrcp.f32 %v1053_v6  ;;  %v1060_v11 = vadd.f32 %v1498_v0, %v1059_v8  ;;  %v1065_v12 = vand.u32 2147483647, %v1052_v60  ;;  %v1082_v26 = vand.u32 2147483648, %v1053_v6 }
  0xd6   : > { %v779_v18 = vpop.f32.mrf.mxu0  ;;  %1501 = vrcp.f32 %v1054_v13  ;;  %vm1076_vm6 = vweird.f32 %v1053_v6  ;;  %v1080_v28 = vand.u32 2147483647, %v1053_v6 }
  0xd7   : > { %v780_v19 = vadd.f32 %v1460_v59, %v779_v18  ;;  %v1064_v17 = vsel %vm1063_vm4, %v1498_v0, %v1060_v11  ;;  %vm1066_vm5 = vcmp.eq.f32.partialorder %v1065_v12, 8.507059e+37  ;;  %v1051_v18 = vsub.f32 1.0, %v1041_v14  ;;  %v1215_v14 = vld [vmem:[%s1886_s10 + $0x8] sm:$0xff] }
  0xd8   : > { %v1069_v21 = vsel %vm1066_vm5, %v1068_v16, %v1064_v17  ;;  %vm1081_vm10 = vcmp.eq.f32.partialorder %v1080_v28, 8.507059e+37  ;;  %1253 = vmatpush.msra.mxu2 %v1215_v14  ;;  %1428 = vmatpush.msra.mxu3 %v1215_v14 }
  0xd9   : > { %v789_v22 = vmax.f32 %v780_v19, 0.0  ;;  %v1044_v19 = vadd.f32 1e-07, %v1038_v55  ;;  %v1055_v5 = vadd.f32 1e-07, %v1051_v18 }
  0xdb   : > { %v961_v24 = vmul.f32 %v957_v20, %v789_v22  ;;  %v1500_v15 = vpop.eup %1499  ;;  %v1070_v23 = vmul.f32 %v1069_v21, %v1044_v19  ;;  %1503 = vrcp.f32 %v1055_v5  ;;  %v1112_v0 = vand.u32 2147483648, %v1055_v5  ;;  %v1214_v19 = vld [vmem:[%s1886_s10] sm:$0xff] }
  0xdc   : > { %v1072_v20 = vmul.f32 %v1500_v15, %v1053_v6  ;;  %v1502_v25 = vpop.eup %1501  ;;  %vm1077_vm7 = vweird.f32 %v1500_v15  ;;  %vm1106_vm15 = vweird.f32 %v1055_v5  ;;  %v1110_v3 = vand.u32 2147483647, %v1055_v5  ;;  %1254 = vmatpush.msra.mxu2 %v1214_v19  ;;  %1429 = vmatpush.msra.mxu3 %v1214_v19 }
  0xdd   : > { %1413 = vmatmul.msk.f32.gmra.mxu1 %vm972_vm9, %v961_v24  ;;  %vm1078_vm8 = vmor %vm1076_vm6, %vm1077_vm7  ;;  %vm1092_vm12 = vweird.f32 %v1502_v25  ;;  %v1113_v4 = vor.u32 1.1754944e-38, %v1112_v0 }
  0xde   : > { %v782_v29 = vpop.f32.mrf.mxu0  ;;  %v1073_v22 = vsub.f32 1.0, %v1072_v20  ;;  %vm1093_vm13 = vmor %vm1091_vm11, %vm1092_vm12  ;;  %vm1111_vm2 = vcmp.eq.f32.partialorder %v1110_v3, 8.507059e+37  ;;  %vm1226_vm12 = vcmask 523264  }
  0xdf   : > { %v783_v30 = vadd.f32 %v1460_v59, %v782_v29  ;;  %v1045_v29 = vadd.f32 1e-07, %v1039_v1 }
  0xe0   : > { %v1074_v24 = vmul.f32 %v1500_v15, %v1073_v22 }
  0xe1   : > { %v790_v33 = vmax.f32 %v783_v30, 0.0  ;;  %v1083_v30 = vor.u32 1.1754944e-38, %v1082_v26 }
  0xe2   : > { %v1075_v27 = vadd.f32 %v1500_v15, %v1074_v24 }
  0xe3   : > { %v962_v35 = vmul.f32 %v958_v31, %v790_v33  ;;  %v1116_v31 = vmul.f32 %v1070_v23, %v1070_v23  ;;  %v1087_v33 = vmul.f32 %v1502_v25, %v1054_v13 }
  0xe4   : > { %v1079_v32 = vsel %vm1078_vm8, %v1500_v15, %v1075_v27 }
  0xe5   : > { %1414 = vmatmul.msk.f32.gmra.mxu1 %vm972_vm9, %v962_v35  ;;  %v1084_v34 = vsel %vm1081_vm10, %v1083_v30, %v1079_v32  ;;  %v1088_v35 = vsub.f32 1.0, %v1087_v33  ;;  %v1120_v36 = vmul.f32 %v1116_v31, %v1116_v31 }
  0xe6   : > { %v785_v37 = vpop.f32.mrf.mxu0 }
  0xe7   : > { %v786_v38 = vadd.f32 %v1460_v59, %v785_v37  ;;  %v1085_v37 = vmul.f32 %v1084_v34, %v1045_v29  ;;  %v1124_v45 = vmul.f32 %v1120_v36, %v1120_v36 }
  0xe9   : > { %v791_v40 = vmax.f32 %v786_v38, 0.0  ;;  %v1089_v38 = vmul.f32 %v1502_v25, %v1088_v35  ;;  %v1128_v55 = vmul.f32 %v1124_v45, %v1116_v31 }
  0xeb   : > { %v963_v41 = vmul.f32 %v959_v39, %v791_v40  ;;  %v1504_v39 = vpop.eup %1503  ;;  %v1097_v40 = vand.u32 2147483648, %v1054_v13 }
  0xec   : > { %v1102_v50 = vmul.f32 %v1504_v39, %v1055_v5  ;;  %vm1107_vm0 = vweird.f32 %v1504_v39 }
  0xed   : > { %1415 = vmatmul.msk.f32.gmra.mxu1 %vm972_vm9, %v963_v41  ;;  %v1090_v41 = vadd.f32 %v1502_v25, %v1089_v38  ;;  %v1098_v44 = vor.u32 1.1754944e-38, %v1097_v40  ;;  %vm1108_vm1 = vmor %vm1106_vm15, %vm1107_vm0 }
  0xef   : > { %v1094_v48 = vsel %vm1093_vm13, %v1502_v25, %v1090_v41 }
  0xf0   : > { %v1099_v51 = vsel %vm1096_vm14, %v1098_v44, %v1094_v48 }
 0x152   : > { %v1002_v46 = vpop.f32.mrf.mxu1 }
 0x153   : > { %v1799_v47 = vadd.f32 %v1461_v42, %v1002_v46  ;;  %v1117_v46 = vmul.f32 %v1085_v37, %v1085_v37 }
 0x155   : > { %v1014_v49 = vmax.f32 %v1799_v47, 0.0  ;;  %v1121_v58 = vmul.f32 %v1117_v46, %v1117_v46 }
 0x157   : > { %1022 = vrot.lane.b32.xlu1 %v1014_v49, %s1561_s22 }
 0x15a   : > { %v1005_v52 = vpop.f32.mrf.mxu1 }
 0x15b   : > { %v1813_v53 = vadd.f32 %v1461_v42, %v1005_v52  ;;  %v1103_v52 = vsub.f32 1.0, %v1102_v50 }
 0x15d   : > { %v1015_v54 = vmax.f32 %v1813_v53, 0.0 }
 0x15f   : > { %1024 = vrot.lane.b32.xlu0 %v1015_v54, %s1561_s22 }
 0x162   : > { %v1008_v56 = vpop.f32.mrf.mxu1 }
 0x163   : > { %v1825_v57 = vadd.f32 %v1461_v42, %v1008_v56  ;;  %v1462_v56 = vld [vmem:[%s1888_s12] ss:$0 sm:$0xff] }
 0x164   : > { %v1135_v6 = vmul.f32 %v1462_v56, %v1128_v55 }
 0x165   : > { %v1016_v59 = vmax.f32 %v1825_v57, 0.0 }
 0x166   : > { %v1139_v11 = vadd.f32 1.0, %v1135_v6 }
 0x167   : > { %1026 = vrot.lane.b32.xlu0 %v1016_v59, %s1561_s22 }
 0x168   : > { %1505 = vrcp.f32 %v1139_v11  ;;  %vm1148_vm3 = vweird.f32 %v1139_v11  ;;  %v1154_v33 = vand.u32 2147483648, %v1139_v11  ;;  %v1152_v36 = vand.u32 2147483647, %v1139_v11 }
 0x16a   : > { %v1011_v61 = vpop.f32.mrf.mxu1  ;;  %vm1153_vm6 = vcmp.eq.f32.partialorder %v1152_v36, 8.507059e+37 }
 0x16b   : > { %v1830_v62 = vadd.f32 %v1461_v42, %v1011_v61  ;;  %v1046_v42 = vadd.f32 1e-07, %v1040_v7  ;;  %v1104_v61 = vmul.f32 %v1504_v39, %v1103_v52  ;;  %v1125_v7 = vmul.f32 %v1121_v58, %v1121_v58 }
 0x16d   : > { %v1017_v63 = vmax.f32 %v1830_v62, 0.0  ;;  %v1100_v60 = vmul.f32 %v1099_v51, %v1046_v42  ;;  %v1105_v1 = vadd.f32 %v1504_v39, %v1104_v61  ;;  %v1129_v12 = vmul.f32 %v1125_v7, %v1117_v46 }
 0x16e   : > { %v1506_v5 = vpop.eup %1505 }
 0x16f   : > { %1028 = vrot.lane.b32.xlu1 %v1017_v63, %s1561_s22  ;;  %v1118_v8 = vmul.f32 %v1100_v60, %v1100_v60  ;;  %v1109_v9 = vsel %vm1108_vm1, %v1504_v39, %v1105_v1  ;;  %v1136_v16 = vmul.f32 %v1462_v56, %v1129_v12  ;;  %v1144_v25 = vmul.f32 %v1506_v5, %v1139_v11 }
 0x170   : > { %v1114_v10 = vsel %vm1111_vm2, %v1113_v4, %v1109_v9  ;;  %vm1149_vm4 = vweird.f32 %v1506_v5  ;;  %v1155_v39 = vor.u32 1.1754944e-38, %v1154_v33 }
 0x171   : > { %v1122_v13 = vmul.f32 %v1118_v8, %v1118_v8  ;;  %v1115_v15 = vmul.f32 %v1114_v10, %v1047_v2  ;;  %v1140_v20 = vadd.f32 1.0, %v1136_v16  ;;  %v1145_v28 = vsub.f32 1.0, %v1144_v25  ;;  %vm1150_vm5 = vmor %vm1148_vm3, %vm1149_vm4  ;;  %v1464_v25 = vld [vmem:[%s1887_s11] ss:$0 sm:$0xff] }
 0x173   : > { %v1126_v17 = vmul.f32 %v1122_v13, %v1122_v13  ;;  %v1119_v18 = vmul.f32 %v1115_v15, %v1115_v15  ;;  %1507 = vrcp.f32 %v1140_v20  ;;  %v1146_v31 = vmul.f32 %v1506_v5, %v1145_v28 }
 0x174   : > { %vm1163_vm7 = vweird.f32 %v1140_v20  ;;  %v1169_v45 = vand.u32 2147483648, %v1140_v20  ;;  %v1167_v48 = vand.u32 2147483647, %v1140_v20 }
 0x175   : > { %v1130_v21 = vmul.f32 %v1126_v17, %v1118_v8  ;;  %v1123_v22 = vmul.f32 %v1119_v18, %v1119_v18  ;;  %v1147_v35 = vadd.f32 %v1506_v5, %v1146_v31 }
 0x176   : > { %v1170_v55 = vor.u32 1.1754944e-38, %v1169_v45  ;;  %vm1168_vm11 = vcmp.eq.f32.partialorder %v1167_v48, 8.507059e+37 }
 0x177   : > { %v1137_v23 = vmul.f32 %v1462_v56, %v1130_v21  ;;  %v1127_v24 = vmul.f32 %v1123_v22, %v1123_v22  ;;  %v1151_v40 = vsel %vm1150_vm5, %v1506_v5, %v1147_v35  ;;  %vm1268_vm5 = vcmask 64512  }
 0x178   : > { %v1156_v44 = vsel %vm1153_vm6, %v1155_v39, %v1151_v40 }
 0x179   : > { %v1141_v26 = vadd.f32 1.0, %v1137_v23  ;;  %v1131_v27 = vmul.f32 %v1127_v24, %v1119_v18  ;;  %v1508_v29 = vpop.eup %1507  ;;  %v1206_v52 = vmul.f32 %v1463_v43, %v1156_v44 }
 0x17a   : > { %v1159_v32 = vmul.f32 %v1508_v29, %v1140_v20  ;;  %vm1164_vm8 = vweird.f32 %v1508_v29 }
 0x17b   : > { %1509 = vrcp.f32 %v1141_v26  ;;  %v1138_v30 = vmul.f32 %v1462_v56, %v1131_v27  ;;  %vm1165_vm10 = vmor %vm1163_vm7, %vm1164_vm8  ;;  %vm1178_vm13 = vweird.f32 %v1141_v26  ;;  %v1184_v3 = vand.u32 2147483648, %v1141_v26 }
 0x17c   : > { %v1160_v37 = vsub.f32 1.0, %v1159_v32  ;;  %v1182_v6 = vand.u32 2147483647, %v1141_v26 }
 0x17d   : > { %v1142_v34 = vadd.f32 1.0, %v1138_v30  ;;  %v1185_v9 = vor.u32 1.1754944e-38, %v1184_v3 }
 0x17e   : > { %v1161_v41 = vmul.f32 %v1508_v29, %v1160_v37  ;;  %vm1183_vm0 = vcmp.eq.f32.partialorder %v1182_v6, 8.507059e+37 }
 0x17f   : > { %1511 = vrcp.f32 %v1142_v34  ;;  %vm1193_vm1 = vweird.f32 %v1142_v34  ;;  %v1199_v15 = vand.u32 2147483648, %v1142_v34  ;;  %v1197_v17 = vand.u32 2147483647, %v1142_v34 }
 0x180   : > { %v1162_v46 = vadd.f32 %v1508_v29, %v1161_v41 }
 0x181   : > { %v1510_v38 = vpop.eup %1509  ;;  %v1200_v14 = vor.u32 1.1754944e-38, %v1199_v15  ;;  %vm1198_vm4 = vcmp.eq.f32.partialorder %v1197_v17, 8.507059e+37 }
 0x182   : > { %v1174_v42 = vmul.f32 %v1510_v38, %v1141_v26  ;;  %v1166_v58 = vsel %vm1165_vm10, %v1508_v29, %v1162_v46  ;;  %vm1179_vm14 = vweird.f32 %v1510_v38 }
 0x183   : > { %v1171_v2 = vsel %vm1168_vm11, %v1170_v55, %v1166_v58  ;;  %vm1180_vm15 = vmor %vm1178_vm13, %vm1179_vm14 }
 0x184   : > { %v1175_v50 = vsub.f32 1.0, %v1174_v42  ;;  %v1207_v8 = vmul.f32 %v1463_v43, %v1171_v2 }
 0x185   : > { %v1512_v51 = vpop.eup %1511 }
 0x186   : > { %v1176_v60 = vmul.f32 %v1510_v38, %v1175_v50  ;;  %v1189_v61 = vmul.f32 %v1512_v51, %v1142_v34  ;;  %vm1194_vm2 = vweird.f32 %v1512_v51 }
 0x187   : > { %vm1195_vm3 = vmor %vm1193_vm1, %vm1194_vm2 }
 0x188   : > { %v1177_v4 = vadd.f32 %v1510_v38, %v1176_v60  ;;  %v1190_v7 = vsub.f32 1.0, %v1189_v61 }
 0x18a   : > { %v1181_v11 = vsel %vm1180_vm15, %v1510_v38, %v1177_v4  ;;  %v1191_v47 = vmul.f32 %v1512_v51, %v1190_v7 }
 0x18b   : > { %v1186_v13 = vsel %vm1183_vm0, %v1185_v9, %v1181_v11 }
 0x18c   : > { %v1192_v16 = vadd.f32 %v1512_v51, %v1191_v47  ;;  %v1208_v18 = vmul.f32 %v1463_v43, %v1186_v13 }
 0x18e   : > { %v1196_v20 = vsel %vm1195_vm3, %v1512_v51, %v1192_v16 }
 0x18f   : > { %v1201_v21 = vsel %vm1198_vm4, %v1200_v14, %v1196_v20 }
 0x190   : > { %v1209_v22 = vmul.f32 %v1463_v43, %v1201_v21 }
 0x1c9   : > { %v1023_v56 = vpop.permute.xlu1 %1022 }
 0x1ca   : > { %v1034_v0 = vsel %vm972_vm9, %v1014_v49, %v1023_v56 }
 0x1cb   : > { %v1210_v1 = vmul.f32 %v1206_v52, %v1034_v0 }
 0x1cd   : > { %1416 = vmatmul.msk.f32.vlgmr.msra.gmra.mxu2 %vm1226_vm12, %v1210_v1 }
 0x1d1   : > { %v1025_v10 = vpop.permute.xlu0 %1024 }
 0x1d2   : > { %v1035_v49 = vsel %vm972_vm9, %v1015_v54, %v1025_v10 }
 0x1d3   : > { %v1211_v12 = vmul.f32 %v1207_v8, %v1035_v49 }
 0x1d5   : > { %1417 = vmatmul.msk.f32.vlgmr.msra.gmra.mxu3 %vm1226_vm12, %v1211_v12 }
 0x1d9   : > { %v1027_v19 = vpop.permute.xlu0 %1026 }
 0x1da   : > { %v1036_v53 = vsel %vm972_vm9, %v1016_v59, %v1027_v19 }
 0x1db   : > { %v1212_v54 = vmul.f32 %v1208_v18, %v1036_v53 }
 0x1dd   : > { %1418 = vmatmul.msk.f32.gmra.mxu3 %vm1226_vm12, %v1212_v54 }
 0x1e1   : > { %v1029_v5 = vpop.permute.xlu1 %1028 }
 0x1e2   : > { %v1037_v23 = vsel %vm972_vm9, %v1017_v63, %v1029_v5 }
 0x1e3   : > { %v1213_v24 = vmul.f32 %v1209_v22, %v1037_v23 }
 0x1e5   : > { %1419 = vmatmul.msk.f32.gmra.mxu3 %vm1226_vm12, %v1213_v24 }
 0x250   : > { %v1256_v57 = vpop.f32.mrf.mxu2 }
 0x251   : > { %v1257_v59 = vadd.f32 %v1464_v25, %v1256_v57 }
 0x253   : > { %1269 = vst.msk [vmem:[%s562_s26] sm:$0xff] %vm1268_vm5, %v1257_v59 }
 0x258   : > { %v1259_v26 = vpop.f32.mrf.mxu3 }
 0x259   : > { %v1260_v27 = vadd.f32 %v1464_v25, %v1259_v26 }
 0x25b   : > { %1270 = vst.msk [vmem:[%s562_s26 + $0x8] sm:$0xff] %vm1268_vm5, %v1260_v27 }
 0x260   : > { %v1262_v62 = vpop.f32.mrf.mxu3 }
 0x261   : > { %v1263_v63 = vadd.f32 %v1464_v25, %v1262_v62 }
 0x263   : > { %1271 = vst.msk [vmem:[%s562_s26 + $0x10] sm:$0xff] %vm1268_vm5, %v1263_v63 }
 0x268   : > { %v1265_v28 = vpop.f32.mrf.mxu3 }
 0x269   : > { %v1266_v29 = vadd.f32 %v1464_v25, %v1265_v28 }
 0x26b   : > { %1272 = vst.msk [vmem:[%s562_s26 + $0x18] sm:$0xff] %vm1268_vm5, %v1266_v29 }
 0x26c PF: > { %s26_s29 = sadd.s32 1, %s1557_s29  }
 0x26d   : > { %p23_p7 = scmp.ge.s32.totalorder %s26_s29, 6  }
 0x26f   :  { %25 = sbr.rel (!%p23_p7) target bundleno = 2 (0x2), region = 124 }
 0x274   :  { %1295 = vsyncpa [#allocation3], 1 }
 0x275   :  { %1297 = vsyncpa [#allocation3 + $0x1], 1 }
 0x276   :  { %1298 = vsyncpa [#allocation5], 1 }

</bundles_post_ra>
